<compile_context>
chip_gen: v6e
topology: v6e:2x2x1
jax: 0.10.0
libtpu: 0.0.40
codegen_flags: <defaults>
</compile_context>

<pallas_src>
import functools
import math

import jax
import jax.numpy as jnp
from jax.experimental import pallas as pl
from jax.experimental.pallas import tpu as pltpu


def _round_up(n, m):
    return ((n + m - 1) // m) * m


# -----------------------------------------------------------------------------
# Pallas kernel
# -----------------------------------------------------------------------------
def _pos_emb_kernel(x_ref, f_ref, p_ref, o_ref):
    """x_ref: (TM, 1) positions, f_ref/p_ref: (1, dim), o_ref: (TM, dim).

    One broadcast mul + add (VPU) and a single full-width sin (VALU polynomial);
    cos is folded in via phase = pi/2 on the first half.  Single lane-dense
    full-tile store.
    """
    o_ref[...] = jnp.sin(x_ref[...] * f_ref[...] + p_ref[...]).astype(o_ref.dtype)


# -----------------------------------------------------------------------------
# Wrapper
# -----------------------------------------------------------------------------
@functools.partial(jax.jit, static_argnames=("dim", "theta"))
def positional_embedding(x, *, dim, theta=10000.0):
    """Pallas implementation of PositionalEmbedding.forward.

    x: any shape, float/int dtype.  Returns float32 of shape x.shape + (dim,).
    """
    assert dim % 2 == 0
    half = dim // 2

    # f_i = 1 / theta**(2i/dim); same frequency feeds both the cos and sin halves.
    base = 1.0 / (theta ** (jnp.arange(half, dtype=jnp.float32) * (2.0 / dim)))
    fdim = jnp.concatenate([base, base]).reshape(1, dim)
    phase = jnp.concatenate(
        [jnp.full((half,), jnp.float32(math.pi / 2.0)),
         jnp.zeros((half,), jnp.float32)]
    ).reshape(1, dim)

    orig_shape = x.shape
    xf = jnp.reshape(x, (-1, 1)).astype(jnp.float32)
    m = xf.shape[0]

    # ---- Tile size from a VMEM budget (safe on v5e/v6e/v7x) ----
    # Per tile row, double-buffered:
    #   output: 2 * dim * 4 B
    #   input (tm,1) block lane-pads to 128 lanes in VMEM: 2 * 512 B
    vmem_budget = 16 * 1024 * 1024
    per_row = 2 * dim * 4 + 2 * 128 * 4
    tm = (vmem_budget // per_row) // 8 * 8
    tm = max(8, min(tm, 8192))
    # Keep at least 2 grid steps so both v7x TensorCores are busy.
    tm = max(8, min(tm, _round_up(-(-m // 2), 8)))
    if tm >= m:
        tm = m  # single full-array block (legal even when m % 8 != 0)

    grid = (pl.cdiv(m, tm),)

    out = pl.pallas_call(
        _pos_emb_kernel,
        out_shape=jax.ShapeDtypeStruct((m, dim), jnp.float32),
        grid=grid,
        in_specs=[
            pl.BlockSpec((tm, 1), lambda i: (i, 0)),      # positions tile
            pl.BlockSpec((1, dim), lambda i: (0, 0)),     # dim-wide freqs (resident)
            pl.BlockSpec((1, dim), lambda i: (0, 0)),     # phase (resident)
        ],
        out_specs=pl.BlockSpec((tm, dim), lambda i: (i, 0)),
        compiler_params=pltpu.CompilerParams(
            dimension_semantics=("parallel",),
            vmem_limit_bytes=32 * 1024 * 1024,            # >= budget, fits v7x (64 MiB)
        ),
        cost_estimate=pl.CostEstimate(
            flops=2 * m * dim,                            # mul + add
            transcendentals=m * dim,                      # one sin per output element
            bytes_accessed=4 * m * dim + 4 * m + 8 * dim,
        ),
    )(xf, fdim, phase)

    # m == prod(orig_shape) and the output is already row-major [..., dim]: free view.
    return out.reshape(orig_shape + (dim,))


# -----------------------------------------------------------------------------
# Pure-JAX reference (mirrors the PyTorch module exactly)
# -----------------------------------------------------------------------------
def positional_embedding_ref(x, dim, theta=10000.0):
    half = dim // 2
    freqs = 1.0 / (theta ** (jnp.arange(half, dtype=jnp.float32) * (2.0 / dim)))
    ang = x[..., None].astype(jnp.float32) * freqs
    return jnp.concatenate([jnp.cos(ang), jnp.sin(ang)], axis=-1)


# -----------------------------------------------------------------------------
if __name__ == "__main__":
    key = jax.random.PRNGKey(0)

    # Small, module-consistent shapes: batch=2, seq=16 positions, dim=128
    # (dim multiple of 128 -> lane-dense output stores; m=32 -> 2 grid steps).
    B, S, DIM = 2, 16, 128
    x = jax.random.uniform(key, (B, S), jnp.float32, minval=0.0, maxval=100.0)

    out = positional_embedding(x, dim=DIM)
    out = jax.block_until_ready(out)

    ref = positional_embedding_ref(x, DIM)

    assert out.shape == (B, S, DIM), out.shape
    assert bool(jnp.all(jnp.isfinite(out)))
    assert bool(jnp.allclose(out, ref, atol=1e-4, rtol=1e-4)), float(
        jnp.max(jnp.abs(out - ref))
    )
    print("KERNEL_OK")
</pallas_src>

<mosaic_0001>
module attributes {stable_mosaic.version = 11 : i64} {
  func.func @_pos_emb_kernel(%arg0: i32, %arg1: memref<16x1xf32, #tpu.memory_space<vmem>>, %arg2: memref<1x128xf32, #tpu.memory_space<vmem>>, %arg3: memref<1x128xf32, #tpu.memory_space<vmem>>, %arg4: memref<16x128xf32, #tpu.memory_space<vmem>>) attributes {dimension_semantics = [#tpu.dimension_semantics<parallel>], iteration_bounds = array<i64: 2>, scalar_prefetch = 0 : i64, scratch_operands = 0 : i64, tpu.core_type = #tpu.core_type<tc>, window_params = [{transform_indices = @transform_0, window_bounds = array<i64: 16, 1>}, {pipeline_mode = #tpu.pipeline_mode<synchronous>, transform_indices = @transform_1, window_bounds = array<i64: 1, 128>}, {pipeline_mode = #tpu.pipeline_mode<synchronous>, transform_indices = @transform_2, window_bounds = array<i64: 1, 128>}, {transform_indices = @transform_3, window_bounds = array<i64: 16, 128>}]} {
    %c0 = arith.constant 0 : index
    %c0_0 = arith.constant 0 : index
    %0 = vector.load %arg1[%c0, %c0_0] : memref<16x1xf32, #tpu.memory_space<vmem>>, vector<16x1xf32>
    %c0_1 = arith.constant 0 : index
    %c0_2 = arith.constant 0 : index
    %1 = vector.load %arg2[%c0_1, %c0_2] : memref<1x128xf32, #tpu.memory_space<vmem>>, vector<1x128xf32>
    %2 = vector.broadcast %0 : vector<16x1xf32> to vector<16x128xf32>
    %3 = vector.broadcast %1 : vector<1x128xf32> to vector<16x128xf32>
    %4 = arith.mulf %2, %3 : vector<16x128xf32>
    %c0_3 = arith.constant 0 : index
    %c0_4 = arith.constant 0 : index
    %5 = vector.load %arg3[%c0_3, %c0_4] : memref<1x128xf32, #tpu.memory_space<vmem>>, vector<1x128xf32>
    %6 = vector.broadcast %5 : vector<1x128xf32> to vector<16x128xf32>
    %7 = arith.addf %4, %6 : vector<16x128xf32>
    %8 = math.sin %7 : vector<16x128xf32>
    %c0_5 = arith.constant 0 : index
    %c0_6 = arith.constant 0 : index
    %9 = vector.load %arg4[%c0_5, %c0_6] : memref<16x128xf32, #tpu.memory_space<vmem>>, vector<16x128xf32>
    tpu.vector_store %arg4[%c0_5, %c0_6], %8 {strides = array<i32>} : memref<16x128xf32, #tpu.memory_space<vmem>>, vector<16x128xf32>,
    return
  }
  func.func @transform_0(%arg0: i32) -> (i32, i32) {
    %c0_i32 = arith.constant 0 : i32
    %c0_i32_0 = arith.constant 0 : i32
    return %arg0, %c0_i32 : i32, i32
  }
  func.func @transform_1(%arg0: i32) -> (i32, i32) {
    %c0_i32 = arith.constant 0 : i32
    %c0_i32_0 = arith.constant 0 : i32
    %c0_i32_1 = arith.constant 0 : i32
    return %c0_i32, %c0_i32_0 : i32, i32
  }
  func.func @transform_2(%arg0: i32) -> (i32, i32) {
    %c0_i32 = arith.constant 0 : i32
    %c0_i32_0 = arith.constant 0 : i32
    %c0_i32_1 = arith.constant 0 : i32
    return %c0_i32, %c0_i32_0 : i32, i32
  }
  func.func @transform_3(%arg0: i32) -> (i32, i32) {
    %c0_i32 = arith.constant 0 : i32
    %c0_i32_0 = arith.constant 0 : i32
    return %arg0, %c0_i32 : i32, i32
  }
}

</mosaic_0001>

<bundles_post_ra>
// kernel: positional_embedding.1
= control target key start
LH: loop header
LB: loop body
LE: loop exit
PB: predicated region body
PF: predicated region fallthrough
CT: control target
= control target key end

     0   :  { %8 = vsyncpa [#allocation3], 0  ;;  %s847_s0 = inlined_call_operand.vmem [shape: f32[32,1], index: 0, kind: input, shape index: {}]   ;;  %s848_s1 = inlined_call_operand.vmem [shape: f32[1,128], index: 1, kind: input, shape index: {}]   ;;  %s849_s2 = inlined_call_operand.vmem [shape: f32[1,128], index: 2, kind: input, shape index: {}]   ;;  %s850_s3 = inlined_call_operand.hbm [shape: f32[32,128], index: 3, kind: output, shape index: {}]  }
   0x1   :  { %10 = vsyncpa [#allocation3 + $0x1], 0  ;;  %s668_s12 = smov 0   ;;  %s670_s13 = smov 0  }
   0x2   :  { %s672_s14 = smov 0   ;;  %s674_s15 = smov 0  }
   0x3 LB: > { %s689_s16 = sadd.s32 4294967295, %s636_s15   ;;  %s488_s17 = sadd.s32 4294967294, %s636_s15   ;;  %s636_s15 = sphi %s674_s15, %s858_s15   ;;  %s632_s14 = sphi %s672_s14, %s857_s14   ;;  %s628_s13 = sphi %s670_s13, %s856_s13   ;;  %s624_s12 = sphi %s668_s12, %s855_s12  }
   0x4   : > { %s693_s18 = sadd.s32 1, %s636_s15   ;;  %s91_s19 = sadd.s32 1, %s632_s14 }
   0x5   : > { %s88_s20 = ssub.s32 %s636_s15, %s693_s18  ;;  %p101_p0 = scmp.ne.s32.totalorder %s632_s14, %s628_s13 }
   0x6   : > { %p89_p1 = scmp.eq.s32.totalorder %s88_s20, 0  ;;  %p102_p2 = scmp.eq.s32.totalorder %s689_s16, 1 }
   0x7   : > { %p107_p3 = scmp.ne.s32.totalorder %s628_s13, %s624_s12  ;;  %p108_p4 = scmp.eq.s32.totalorder %s488_s17, 1 }
   0x8   : > { %s704_s21 = scalar_select %p89_p1, %s632_s14, %s91_s19  }
   0x9   : > { %p706_p5 = por %p102_p2, %p101_p0  ;;  %p710_p6 = por %p108_p4, %p107_p3 }
   0xa   : > { %p491_p7 = scmp.ge.s32.totalorder %s636_s15, 1  ;;  %p141_p8 = scmp.lt.s32.totalorder %s636_s15, 3 }
   0xc   : > { %p142_p9 = pnand %p491_p7, %p141_p8 }
   0xd   : > { %s493_s24 = sshll.u32 (!%p142_p9), %s689_s16, 1  ;;  %s162_s6 = sand.u32 (!%p142_p9), 1, %s628_s13  }
   0xe   : > { %145 = sbr.rel (%p142_p9) target bundleno = 258 (0x102), region = 32  ;;  %p166_p10 = scmp.lt.s32.totalorder (!%p142_p9), %s493_s24, 3 }
   0xf   : > { %s492_s7 = sshll.u32 (!%p142_p9), %s162_s6, 4  ;;  %s510_s9 = sshll.u32 (!%p142_p9), %s689_s16, 8 }
  0x10   : > { %s164_s8 = scalar_lea.vmem (!%p142_p9), [#allocation2], %s492_s7  ;;  %s800_s19 = scalar_lea.hbm (!%p142_p9), %s850_s3, %s510_s9 }
  0x11   : > { %s426_s10 = sshll.u32 (!%p142_p9), %s164_s8, 4  ;;  %s807_s16 = scalar_lea.sflag (!%p142_p9), [#allocation3], %s162_s6  ;;  %s802_s10 = int_to_ptr.vmem [resolvable:$true] %s426_s10 }
  0x12   : > { %s576_s20 = scalar_lea.vmem (!%p142_p9), %s802_s10, 256 }
  0x13   : > { %v638_v0 = vmov 0   ;;  %s860_s24 = smov (!%p166_p10, %s493_s24), 3  ;;  %v495_v3 = vld [vmem:[%s848_s1] ss:$0 sm:$0xff]  ;;  %v639_v27 = vmov 683565275   ;;  %p577_p11 = scmp.ne.s32.totalorder %s802_s10, %s576_s20 }
  0x14   : > { %567 = vset.pattern.permute.xlu0 %v638_v0  ;;  %s494_s25 = sshll.u32 %s860_s24, 3  ;;  %v496_v4 = vld [vmem:[%s849_s2] ss:$0 sm:$0xff]  ;;  %v640_v31 = vmov 2475754826   ;;  %s645_s24 = smov [#allocation2]  }
  0x15   : > { %s169_s28 = scalar_lea.vmem %s847_s0, %s494_s25  ;;  %v641_v33 = vmov 2131351028   ;;  %v642_v35 = vmov 2102212464   ;;  %v643_v37 = vmov 920167782   ;;  %p578_p12 = pnand %p577_p11, %p706_p5 }
  0x16   : > { %v172_v1 = vld [vmem:[%s169_s28] sm:$0xff]  ;;  %v173_v2 = vld [vmem:[%s169_s28 + $0x8] sm:$0xff]  ;;  %v644_v44 = vmov 1326507024   ;;  %s580_s25 = sshll.u32 %s645_s24, 4  ;;  %s581_s25 = int_to_ptr.vmem [resolvable:$false] %s580_s25 }
  0x17   : > { %177 = vperm.xlu0 %567, %v172_v1   ;;  %p579_p13 = pneg %p578_p12  ;;  %s582_s26 = scalar_lea.vmem %s581_s25, 512 }
  0x18   : > { %p583_p0 = scmp.lt.s32.totalorder %s802_s10, %s581_s25  ;;  %p584_p1 = scmp.lt.s32.totalorder %s582_s26, %s576_s20 }
  0x1a   : > { %p585_p2 = por %p584_p1, %p583_p0 }
  0x1b   : > { %182 = vperm.xlu0 %567, %v173_v2  }
  0x1c   : > { %p586_p3 = pnand %p585_p2, %p579_p13 }
  0x92   : > { %v178_v5 = vpop.permute.xlu0 %177 }
  0x93   : > { %v191_v6 = vmul.f32 %v495_v3, %v178_v5 }
  0x95   : > { %v726_v7 = vadd.f32 %v496_v4, %v191_v6 }
  0x96   : > { %v183_v8 = vpop.permute.xlu0 %182 }
  0x97   : > { %v202_v9 = vand.u32 2147483647, %v726_v7  ;;  %v205_v10 = vand.u32 2139095040, %v726_v7  ;;  %v192_v11 = vmul.f32 %v495_v3, %v183_v8  ;;  %vm204_vm14 = vcmp.lt.s32.totalorder %v726_v7, 0 }
  0x99   : > { %v206_v12 = vshrl.u32 %v205_v10, 23  ;;  %v730_v13 = vadd.f32 %v496_v4, %v192_v11  ;;  %v209_v14 = vand.u32 8388607, %v202_v9  ;;  %vm203_vm15 = vcmp.le.f32.partialorder %v202_v9, 0.7853982 }
  0x9b   : > { %v497_v15 = vadd.s32 4294967169, %v206_v12  ;;  %v309_v16 = vand.u32 2139095040, %v730_v13  ;;  %v210_v18 = vor.u32 8388608, %v209_v14  ;;  %v306_v20 = vand.u32 2147483647, %v730_v13 }
  0x9d   : > { %v212_v17 = vadd.s32 1, %v497_v15  ;;  %v310_v19 = vshrl.u32 %v309_v16, 23  ;;  %v736_v25 = vshll.u32 %v210_v18, 8  ;;  %v313_v29 = vand.u32 8388607, %v306_v20 }
  0x9f   : > { %vm213_vm0 = vcmp.gt.s32.totalorder %v212_v17, 0  ;;  %v501_v22 = vadd.s32 4294967169, %v310_v19  ;;  %v314_v59 = vor.u32 8388608, %v313_v29 }
  0xa0   : > { %v214_v21 = vsel %vm213_vm0, %v212_v17, 0  ;;  %vm308_vm0 = vcmp.lt.s32.totalorder %v730_v13, 0 }
  0xa1   : > { %v215_v23 = vshrl.u32 %v214_v21, 5  ;;  %v216_v24 = vand.u32 31, %v214_v21  ;;  %v316_v30 = vadd.s32 1, %v501_v22  ;;  %v354_v10 = vshll.u32 %v314_v59, 8 }
  0xa3   : > { %v217_v26 = vsub.s32 32, %v216_v24  ;;  %v219_v28 = vshll.u32 %v639_v27, %v216_v24  ;;  %v222_v32 = vshll.u32 %v640_v31, %v216_v24  ;;  %v225_v34 = vshll.u32 %v641_v33, %v216_v24 }
  0xa4   : > { %v228_v36 = vshll.u32 %v642_v35, %v216_v24  ;;  %v231_v38 = vshll.u32 %v643_v37, %v216_v24  ;;  %vm234_vm1 = vcmp.lt.s32.totalorder %v215_v23, 1  ;;  %vm236_vm2 = vcmp.lt.s32.totalorder %v215_v23, 3 }
  0xa5   : > { %v220_v39 = vshrl.u32 %v640_v31, %v217_v26  ;;  %v223_v40 = vshrl.u32 %v641_v33, %v217_v26  ;;  %v226_v41 = vshrl.u32 %v642_v35, %v217_v26  ;;  %v218_v42 = vshrl.u32 %v639_v27, %v217_v26 }
  0xa6   : > { %v229_v43 = vshrl.u32 %v643_v37, %v217_v26  ;;  %v232_v45 = vshrl.u32 %v644_v44, %v217_v26  ;;  %vm317_vm3 = vcmp.gt.s32.totalorder %v316_v30, 0  ;;  %vm237_vm4 = vcmp.lt.s32.totalorder %v215_v23, 4 }
  0xa7   : > { %v221_v46 = vor.u32 %v220_v39, %v219_v28  ;;  %v224_v47 = vor.u32 %v223_v40, %v222_v32  ;;  %v227_v48 = vor.u32 %v226_v41, %v225_v34  ;;  %v318_v51 = vsel %vm317_vm3, %v316_v30, 0 }
  0xa8   : > { %v230_v49 = vor.u32 %v229_v43, %v228_v36  ;;  %v233_v50 = vor.u32 %v232_v45, %v231_v38  ;;  %vm235_vm5 = vcmp.lt.s32.totalorder %v215_v23, 2  ;;  %v320_v62 = vand.u32 31, %v318_v51 }
  0xa9   : > { %v238_v52 = vsel %vm234_vm1, %v218_v42, %v221_v46  ;;  %v239_v53 = vsel %vm237_vm4, %v227_v48, 2102212464  ;;  %v242_v54 = vsel %vm234_vm1, %v221_v46, %v224_v47  ;;  %v246_v55 = vsel %vm234_vm1, %v224_v47, %v227_v48 }
  0xaa   : > { %v240_v56 = vsel %vm236_vm2, %v224_v47, %v239_v53  ;;  %v243_v57 = vsel %vm237_vm4, %v230_v49, 920167782  ;;  %v247_v58 = vsel %vm237_vm4, %v233_v50, 1326507024  ;;  %v319_v6 = vshrl.u32 %v318_v51, 5 }
  0xab   : > { %v244_v60 = vsel %vm236_vm2, %v227_v48, %v243_v57  ;;  %v248_v61 = vsel %vm236_vm2, %v230_v49, %v247_v58  ;;  %v241_v63 = vsel %vm235_vm5, %v238_v52, %v240_v56  ;;  %v321_v8 = vsub.s32 32, %v320_v62 }
  0xac   : > { %v245_v0 = vsel %vm235_vm5, %v242_v54, %v244_v60  ;;  %v249_v1 = vsel %vm235_vm5, %v246_v55, %v248_v61  ;;  %v257_v11 = vmul.u32 %v736_v25, %v241_v63  ;;  %v323_v12 = vshll.u32 %v639_v27, %v320_v62 }
  0xad   : > { %v749_v2 = vmul.u32.u64.low %v736_v25, %v249_v1  ;;  %v750_v3 = vmul.u32.u64.high %v736_v25, %v249_v1, %v749_v2  ;;  %v753_v4 = vmul.u32.u64.low %v736_v25, %v245_v0  ;;  %v754_v5 = vmul.u32.u64.high %v736_v25, %v245_v0, %v753_v4 }
  0xae   : > { %v326_v14 = vshll.u32 %v640_v31, %v320_v62  ;;  %v329_v15 = vshll.u32 %v641_v33, %v320_v62  ;;  %v324_v16 = vshrl.u32 %v640_v31, %v321_v8  ;;  %v327_v17 = vshrl.u32 %v641_v33, %v321_v8 }
  0xaf   : > { %v330_v18 = vshrl.u32 %v642_v35, %v321_v8  ;;  %v332_v19 = vshll.u32 %v642_v35, %v320_v62  ;;  %vm259_vm6 = vc.u32 %v750_v3, %v753_v4  ;;  %v260_v21 = vadd.s32 1, %v754_v5 }
  0xb0   : > { %v333_v22 = vshrl.u32 %v643_v37, %v321_v8  ;;  %v335_v23 = vshll.u32 %v643_v37, %v320_v62  ;;  %v325_v24 = vor.u32 %v324_v16, %v323_v12  ;;  %v328_v26 = vor.u32 %v327_v17, %v326_v14 }
  0xb1   : > { %v331_v28 = vor.u32 %v330_v18, %v329_v15  ;;  %v336_v29 = vshrl.u32 %v644_v44, %v321_v8  ;;  %v261_v25 = vsel %vm259_vm6, %v260_v21, %v754_v5  ;;  %vm338_vm7 = vcmp.lt.s32.totalorder %v319_v6, 1 }
  0xb2   : > { %v334_v30 = vor.u32 %v333_v22, %v332_v19  ;;  %vm341_vm8 = vcmp.lt.s32.totalorder %v319_v6, 4  ;;  %v262_v31 = vadd.s32 %v261_v25, %v257_v11  ;;  %vm340_vm9 = vcmp.lt.s32.totalorder %v319_v6, 3 }
  0xb3   : > { %v337_v32 = vor.u32 %v336_v29, %v335_v23  ;;  %v343_v33 = vsel %vm341_vm8, %v331_v28, 2102212464  ;;  %v322_v34 = vshrl.u32 %v639_v27, %v321_v8  ;;  %v346_v35 = vsel %vm338_vm7, %v325_v24, %v328_v26 }
  0xb4   : > { %v347_v36 = vsel %vm341_vm8, %v334_v30, 920167782  ;;  %v350_v38 = vsel %vm338_vm7, %v328_v26, %v331_v28  ;;  %v263_v39 = vadd.s32 536870912, %v262_v31  ;;  %vm339_vm10 = vcmp.lt.s32.totalorder %v319_v6, 2 }
  0xb5   : > { %v348_v37 = vsel %vm340_vm9, %v331_v28, %v347_v36  ;;  %v351_v40 = vsel %vm341_vm8, %v337_v32, 1326507024  ;;  %v342_v41 = vsel %vm338_vm7, %v322_v34, %v325_v24  ;;  %v344_v42 = vsel %vm340_vm9, %v328_v26, %v343_v33 }
  0xb6   : > { %v349_v43 = vsel %vm339_vm10, %v346_v35, %v348_v37  ;;  %v352_v44 = vsel %vm340_vm9, %v334_v30, %v351_v40  ;;  %v264_v45 = vshrl.u32 %v263_v39, 30  ;;  %v345_v51 = vsel %vm339_vm10, %v342_v41, %v344_v42 }
  0xb7   : > { %v353_v46 = vsel %vm339_vm10, %v350_v38, %v352_v44  ;;  %v764_v47 = vmul.u32.u64.low %v354_v10, %v349_v43  ;;  %v765_v48 = vmul.u32.u64.high %v354_v10, %v349_v43, %v764_v47  ;;  %v361_v54 = vmul.u32 %v354_v10, %v345_v51 }
  0xb8   : > { %v767_v49 = vmul.u32.u64.low %v354_v10, %v353_v46  ;;  %v768_v50 = vmul.u32.u64.high %v354_v10, %v353_v46, %v767_v49  ;;  %v265_v27 = vshll.u32 %v264_v45, 30  ;;  %v258_v2 = vadd.s32 %v753_v4, %v750_v3 }
  0xb9   : > { %v364_v53 = vadd.s32 1, %v765_v48  ;;  %v288_v29 = vsub.s32 4, %v264_v45  ;;  %vm783_vm1 = vcmp.le.f32.partialorder %v306_v20, 0.7853982  ;;  %vm294_vm5 = vweird.f32 %v726_v7 }
  0xba   : > { %v266_v52 = vsub.s32 %v262_v31, %v265_v27  ;;  %vm363_vm11 = vc.u32 %v768_v50, %v764_v47  ;;  %v362_v26 = vadd.s32 %v764_v47, %v768_v50  ;;  %vm398_vm9 = vweird.f32 %v730_v13 }
  0xbb   : > { %v365_v56 = vsel %vm363_vm11, %v364_v53, %v765_v48  ;;  %v289_v36 = vsel %vm204_vm14, %v288_v29, %v264_v45 }
  0xbc   : > { %v268_v55 = vsub.s32 0, %v266_v52  ;;  %v366_v57 = vadd.s32 %v365_v56, %v361_v54  ;;  %v291_v40 = vsel %vm203_vm15, 0, %v289_v36 }
  0xbd   : > { %v295_v42 = vadd.s32 3, %v291_v40 }
  0xbe   : > { %v498_v58 = vmin.u32 %v268_v55, %v266_v52  ;;  %v367_v59 = vadd.s32 536870912, %v366_v57 }
  0xbf   : > { %v296_v47 = vand.u32 3, %v295_v42 }
  0xc0   : > { %v270_v60 = vclz %v498_v58  ;;  %v368_v61 = vshrl.u32 %v367_v59, 30 }
  0xc1   : > { %vm301_vm2 = vcmp.eq.s32.totalorder %v296_v47, 2  ;;  %vm298_vm3 = vcmp.eq.s32.totalorder %v296_v47, 0  ;;  %vm297_vm4 = vcmp.lt.s32.totalorder %v296_v47, 2 }
  0xc2   : > { %v499_v62 = vadd.s32 4294967294, %v270_v60  ;;  %v369_v63 = vshll.u32 %v368_v61, 30  ;;  %v392_v9 = vsub.s32 4, %v368_v61 }
  0xc4   : > { %vm500_vm12 = vcmp.lt.s32.totalorder %v499_v62, 0  ;;  %v370_v1 = vsub.s32 %v366_v57, %v369_v63  ;;  %v393_v48 = vsel %vm308_vm0, %v392_v9, %v368_v61 }
  0xc5   : > { %v273_v0 = vsel %vm500_vm12, 0, %v499_v62  ;;  %v395_v20 = vsel %vm783_vm1, 0, %v393_v48 }
  0xc6   : > { %v274_v5 = vsub.s32 32, %v273_v0  ;;  %v278_v6 = vsub.s32 4294967266, %v273_v0  ;;  %v372_v8 = vsub.s32 0, %v370_v1  ;;  %v275_v10 = vshll.u32 %v266_v52, %v273_v0 }
  0xc7   : > { %v399_v54 = vadd.s32 3, %v395_v20 }
  0xc8   : > { %v276_v11 = vshrl.u32 %v258_v2, %v274_v5  ;;  %v279_v12 = vadd.s32 127, %v278_v6  ;;  %v502_v14 = vmin.u32 %v372_v8, %v370_v1 }
  0xc9   : > { %v400_v57 = vand.u32 3, %v399_v54 }
  0xca   : > { %v277_v15 = vor.u32 %v276_v11, %v275_v10  ;;  %v280_v16 = vshll.u32 %v279_v12, 23  ;;  %v374_v17 = vclz %v502_v14 }
  0xcb   : > { %vm405_vm6 = vcmp.eq.s32.totalorder %v400_v57, 2  ;;  %vm402_vm7 = vcmp.eq.s32.totalorder %v400_v57, 0  ;;  %vm401_vm8 = vcmp.lt.s32.totalorder %v400_v57, 2 }
  0xcc   : > { %v281_v18 = vor.u32 4788187, %v280_v16  ;;  %v503_v19 = vadd.s32 4294967294, %v374_v17  ;;  %v284_v22 = vcvt.s32.f32 %v277_v15 }
  0xce   : > { %v282_v21 = vand.u32 2147483647, %v281_v18  ;;  %vm504_vm13 = vcmp.lt.s32.totalorder %v503_v19, 0 }
  0xcf   : > { %v377_v24 = vsel %vm504_vm13, 0, %v503_v19 }
  0xd0   : > { %v285_v23 = vmul.f32 %v284_v22, %v282_v21  ;;  %v378_v3 = vsub.s32 32, %v377_v24  ;;  %v382_v4 = vsub.s32 4294967266, %v377_v24  ;;  %v379_v25 = vshll.u32 %v370_v1, %v377_v24 }
  0xd2   : > { %v286_v28 = vxor.u32 2147483648, %v285_v23  ;;  %v380_v30 = vshrl.u32 %v362_v26, %v378_v3  ;;  %v383_v31 = vadd.s32 127, %v382_v4 }
  0xd4   : > { %v287_v32 = vsel %vm204_vm14, %v286_v28, %v285_v23  ;;  %v381_v34 = vor.u32 %v380_v30, %v379_v25  ;;  %v384_v35 = vshll.u32 %v383_v31, 23 }
  0xd5   : > { %v290_v33 = vsel %vm203_vm15, %v726_v7, %v287_v32 }
  0xd6   : > { %568 = vcosq.f32 %v290_v33  ;;  %v385_v38 = vor.u32 4788187, %v384_v35  ;;  %v388_v37 = vcvt.s32.f32 %v381_v34 }
  0xd7   : > { %570 = vsinq.f32 %v290_v33 }
  0xd8   : > { %v386_v39 = vand.u32 2147483647, %v385_v38 }
  0xda   : > { %v389_v41 = vmul.f32 %v388_v37, %v386_v39 }
  0xdc   : > { %v390_v43 = vxor.u32 2147483648, %v389_v41 }
  0xde   : > { %v391_v45 = vsel %vm308_vm0, %v390_v43, %v389_v41 }
  0xdf   : > { %v394_v46 = vsel %vm783_vm1, %v730_v13, %v391_v45 }
  0xe0   : > { %572 = vcosq.f32 %v394_v46 }
  0xe1   : > { %574 = vsinq.f32 %v394_v46 }
  0xe3   : > { %v569_v49 = vpop.eup %568 }
  0xe4   : > { %v571_v50 = vpop.eup %570  ;;  %v302_v27 = vxor.u32 2147483648, %v569_v49 }
  0xe5   : > { %v299_v51 = vxor.u32 2147483648, %v571_v50 }
  0xe6   : > { %v303_v52 = vsel %vm301_vm2, %v302_v27, %v571_v50 }
  0xe7   : > { %v300_v53 = vsel %vm298_vm3, %v569_v49, %v299_v51 }
  0xe8   : > { %v304_v55 = vsel %vm297_vm4, %v300_v53, %v303_v52 }
  0xe9   : > { %v305_v56 = vsel %vm294_vm5, nan, %v304_v55 }
  0xea   : > { %410 = vst [vmem:[%s164_s8] sm:$0xff] %v305_v56 }
  0xed   : > { %v573_v58 = vpop.eup %572 }
  0xee   : > { %v575_v59 = vpop.eup %574  ;;  %v406_v60 = vxor.u32 2147483648, %v573_v58 }
  0xef   : > { %v403_v61 = vxor.u32 2147483648, %v575_v59 }
  0xf0   : > { %v407_v62 = vsel %vm405_vm6, %v406_v60, %v575_v59 }
  0xf1   : > { %v404_v63 = vsel %vm402_vm7, %v573_v58, %v403_v61 }
  0xf2   : > { %v408_v7 = vsel %vm401_vm8, %v404_v63, %v407_v62 }
  0xf3   : > { %v409_v0 = vsel %vm398_vm9, nan, %v408_v7 }
  0xf4   : > { %411 = vst [vmem:[%s164_s8 + $0x8] sm:$0xff] %v409_v0 }
  0xf5   : > { %589 = shalt.err (!%p586_p3)
}
  0xf6   : > { %s590_s27 = scalar_lea.hbm %s800_s19, 256  ;;  %s594_s30 = scalar_lea.hbm %s850_s3, 512 }
  0xf7   : > { %p591_p4 = scmp.ne.s32.totalorder %s800_s19, %s590_s27  ;;  %p595_p9 = scmp.lt.s32.totalorder %s800_s19, %s850_s3 }
  0xf8   : > { %p596_p10 = scmp.lt.s32.totalorder %s594_s30, %s590_s27 }
  0xf9   : > { %p592_p7 = pnand %p591_p4, %p706_p5 }
  0xfa   : > { %p597_p11 = por %p596_p10, %p595_p9 }
  0xfb   : > { %p593_p8 = pneg %p592_p7 }
  0xfd   : > { %p598_p12 = pnand %p597_p11, %p593_p8 }
  0xff   : > { %601 = shalt.err (!%p598_p12)
}
 0x100   : > { %s646_s6 = smov 128   ;;  %s647_s7 = smov 8  }
 0x101   : > { %519 = dma.vmem_to_hbm [thread:$0]  (%p706_p5), %s802_s10, 256, %s800_s19, %s807_s16, %s646_s6, %s646_s6, %s647_s7  }
 0x102 PF: > { %p525_p13 = scmp.ge.s32.totalorder %s636_s15, 2  ;;  %s441_s8 = sand.u32 1, %s624_s12  }
 0x103   : > { %s442_s9 = scalar_lea.sflag [#allocation3], %s441_s8 }
 0x104   : > { %p522_p0 = pnand %p525_p13, %p710_p6 }
 0x106   : > { %p523_p1 = pneg %p522_p0 }
 0x108   : > { %619 = dma.done.wait (%p523_p1), %s442_s9, 256  }
 0x109   : > { %621 = vsyncadd (%p523_p1), %s442_s9, 4294967040  ;;  %p13_p2 = scmp.ge.s32.totalorder %s693_s18, 4   ;;  %s855_s12 = smov %s628_s13 }
 0x10a   : > { %s856_s13 = smov %s632_s14  ;;  %s857_s14 = smov %s704_s21 }
 0x10b   : > { %s858_s15 = smov %s693_s18  ;;  %15 = sbr.rel (!%p13_p2) target bundleno = 3 (0x3), region = 67 }
 0x110   :  { %447 = vsyncpa [#allocation3], 1 }
 0x111   :  { %449 = vsyncpa [#allocation3 + $0x1], 1 }

</bundles_post_ra>
